<compile_context>
chip_gen: v7x
topology: tpu7x:2x2x1
jax: 0.10.0
libtpu: 0.0.40
codegen_flags: <defaults>
</compile_context>

<pallas_src>
import jax
import jax.numpy as jnp
from jax.experimental import pallas as pl
from jax.experimental.pallas import tpu as pltpu


def autoencoder_kernel(
    x_ref,
    a1_ref, c1_ref,
    a2_ref, c2_ref,
    a3_ref, c3_ref,   # fused fc3_e + fc1_d (n_z bottleneck folded out)
    a4_ref, c4_ref,
    a5_ref, c5_ref,
    out_ref,
):
    # Sigmoid affine pieces are pre-folded into (a_i, c_i) in the wrapper, so
    # each hidden layer is just: t = tanh(t_prev @ a_i + c_i)  (bare EUP tanh).
    t = jnp.tanh(
        jnp.dot(x_ref[...].astype(a1_ref.dtype), a1_ref[...],
                preferred_element_type=jnp.float32) + c1_ref[...])
    t = jnp.tanh(
        jnp.dot(t.astype(a2_ref.dtype), a2_ref[...],
                preferred_element_type=jnp.float32) + c2_ref[...])
    t = jnp.tanh(
        jnp.dot(t.astype(a3_ref.dtype), a3_ref[...],
                preferred_element_type=jnp.float32) + c3_ref[...])
    t = jnp.tanh(
        jnp.dot(t.astype(a4_ref.dtype), a4_ref[...],
                preferred_element_type=jnp.float32) + c4_ref[...])
    y = jnp.dot(t.astype(a5_ref.dtype), a5_ref[...],
                preferred_element_type=jnp.float32) + c5_ref[...]
    out_ref[...] = y.astype(out_ref.dtype)


def _round_up(x, m):
    return ((x + m - 1) // m) * m


def _fold_through_sigmoid(w, b, *, feeds_tanh):
    """Fold the previous layer's sigmoid output form h = 0.5*t + 0.5 into (w, b):
         (0.5*t + 0.5) @ w + b == t @ (0.5*w) + (0.5*sum_in(w) + b)
       If this layer itself feeds a tanh (i.e. has a sigmoid), also absorb the
       0.5 inside tanh(0.5*pre)."""
    w_eff = 0.5 * w
    b_eff = 0.5 * jnp.sum(w, axis=0, keepdims=True) + b
    if feeds_tanh:
        w_eff = 0.5 * w_eff
        b_eff = 0.5 * b_eff
    return w_eff, b_eff


def autoencoder_forward(x, params, *, block_batch=512, use_bf16_matmul=True,
                        out_dtype=None):
    """x: (batch, space_dim) f32.  params: dict of (in,out) weights and (1,out)
    biases (transpose of PyTorch Linear.weight layout).

    block_batch: max batch rows per grid step (weights stay VMEM-resident).
    use_bf16_matmul: bf16 weights + in-kernel LHS casts (native MXU rate);
                     accumulation, biases and tanh stay f32.
    out_dtype: output dtype (default: x.dtype); bf16 halves writeback traffic.
    """
    batch, space_dim = x.shape
    out_dtype = x.dtype if out_dtype is None else out_dtype

    # ---- algebraic fusion of the activation-free bottleneck (all in f32) ----
    #   z = h @ w3e + b3e ; d = z @ w1d + b1d  ==  h @ (w3e@w1d) + (b3e@w1d + b1d)
    w_mid = params["w3e"] @ params["w1d"]
    b_mid = params["b3e"] @ params["w1d"] + params["b1d"]

    # ---- fold sigmoid(x) = 0.5*tanh(0.5*x) + 0.5 into weights (all in f32) ----
    a1, c1 = 0.5 * params["w1e"], 0.5 * params["b1e"]   # x enters directly
    a2, c2 = _fold_through_sigmoid(params["w2e"], params["b2e"], feeds_tanh=True)
    a3, c3 = _fold_through_sigmoid(w_mid, b_mid, feeds_tanh=True)
    a4, c4 = _fold_through_sigmoid(params["w2d"], params["b2d"], feeds_tanh=True)
    a5, c5 = _fold_through_sigmoid(params["w3d"], params["b3d"], feeds_tanh=False)

    mm_dtype = jnp.bfloat16 if use_bf16_matmul else x.dtype
    weights = [a.astype(mm_dtype) for a in (a1, a2, a3, a4, a5)]
    biases = [c1, c2, c3, c4, c5]                        # stay f32
    operands = []
    for w, b in zip(weights, biases):
        operands += [w, b]

    # ---- batch tiling: big tiles (low per-step overhead) and >=2 tiles for
    #      batches > 16 so v7x's two TensorCores can split the grid ----
    if batch <= 16:
        tb = batch
    else:
        tb = min(block_batch, _round_up(pl.cdiv(batch, 2), 8))
    grid = (pl.cdiv(batch, tb),)

    batch_tile_spec = pl.BlockSpec((tb, space_dim), lambda i: (i, 0))

    def resident_spec(a):
        # Constant block index -> parameter is DMA'd once and stays
        # VMEM-resident across all batch tiles.
        return pl.BlockSpec(a.shape, lambda i: (0,) * a.ndim)

    # ---- advisory cost estimate so XLA schedules/overlaps the call well ----
    flops = 2 * batch * sum(int(w.shape[0]) * int(w.shape[1]) for w in weights)
    transcendentals = batch * sum(int(w.shape[1]) for w in weights[:-1])
    out_itemsize = jax.dtypes.canonicalize_dtype(out_dtype).itemsize
    bytes_accessed = (
        int(x.size) * x.dtype.itemsize
        + batch * space_dim * out_itemsize
        + sum(int(a.size) * a.dtype.itemsize for a in operands)
    )

    return pl.pallas_call(
        autoencoder_kernel,
        out_shape=jax.ShapeDtypeStruct((batch, space_dim), out_dtype),
        grid=grid,
        in_specs=[batch_tile_spec] + [resident_spec(a) for a in operands],
        out_specs=batch_tile_spec,
        compiler_params=pltpu.CompilerParams(
            # Independent batch tiles: shard across v7x's two TensorCores;
            # harmless on single-TC v5e/v6e.
            dimension_semantics=("parallel",),
            # Explicit headroom (v5e's scoped default is only 16 MiB).
            vmem_limit_bytes=32 * 1024 * 1024,
        ),
        cost_estimate=pl.CostEstimate(
            flops=flops,
            transcendentals=transcendentals,
            bytes_accessed=bytes_accessed),
    )(x, *operands)


def make_params(key, space_dim, hidden_units, n_z):
    """Deterministic synthetic parameters (PyTorch Linear init, stored (in,out))."""
    h0, h1 = hidden_units
    layer_dims = [
        ("1e", space_dim, h0),
        ("2e", h0, h1),
        ("3e", h1, n_z),
        ("1d", n_z, h1),
        ("2d", h1, h0),
        ("3d", h0, space_dim),
    ]
    params = {}
    for name, fan_in, fan_out in layer_dims:
        key, kw, kb = jax.random.split(key, 3)
        bound = 1.0 / jnp.sqrt(fan_in)
        # stored as (in, out): equals transpose of PyTorch's (out, in) weight
        params["w" + name] = jax.random.uniform(
            kw, (fan_in, fan_out), jnp.float32, -bound, bound)
        params["b" + name] = jax.random.uniform(
            kb, (1, fan_out), jnp.float32, -bound, bound)
    return params


def reference_forward(x, params):
    """Plain-JAX reference matching the original (unfused) PyTorch forward."""
    h = jax.nn.sigmoid(x @ params["w1e"] + params["b1e"])
    h = jax.nn.sigmoid(h @ params["w2e"] + params["b2e"])
    z = h @ params["w3e"] + params["b3e"]
    h = jax.nn.sigmoid(z @ params["w1d"] + params["b1d"])
    h = jax.nn.sigmoid(h @ params["w2d"] + params["b2d"])
    return h @ params["w3d"] + params["b3d"]


if __name__ == "__main__":
    # Small shapes consistent with the module: 2 hidden layers.
    space_dim = 128
    hidden_units = [64, 32]
    n_z = 8
    batch = 64   # small, but > 16 so the multi-tile / megacore path is exercised

    key = jax.random.PRNGKey(0)
    key, kx = jax.random.split(key)
    x = jax.random.normal(kx, (batch, space_dim), jnp.float32)
    params = make_params(key, space_dim, hidden_units, n_z)

    ref = reference_forward(x, params)

    # Exactness check: f32 weights. Bottleneck fusion + sigmoid->tanh folding
    # are algebraically exact; only f32 rounding differs.
    out_f32 = jax.block_until_ready(
        autoencoder_forward(x, params, use_bf16_matmul=False))
    assert out_f32.shape == (batch, space_dim)
    assert jnp.allclose(out_f32, ref, atol=1e-4, rtol=1e-4), "f32 mismatch vs reference"

    # Default fast path: bf16 weights (f32 accumulation) -> looser tolerance.
    out = jax.block_until_ready(autoencoder_forward(x, params))
    assert out.shape == (batch, space_dim)
    assert jnp.allclose(out, ref, atol=5e-2, rtol=5e-2), "bf16 mismatch vs reference"

    print("KERNEL_OK")
</pallas_src>

<mosaic_0001>
module attributes {stable_mosaic.version = 11 : i64} {
  func.func @autoencoder_kernel(%arg0: i32, %arg1: memref<32x128xf32, #tpu.memory_space<vmem>>, %arg2: memref<128x64xf32, #tpu.memory_space<vmem>>, %arg3: memref<1x64xf32, #tpu.memory_space<vmem>>, %arg4: memref<64x32xf32, #tpu.memory_space<vmem>>, %arg5: memref<1x32xf32, #tpu.memory_space<vmem>>, %arg6: memref<32x32xf32, #tpu.memory_space<vmem>>, %arg7: memref<1x32xf32, #tpu.memory_space<vmem>>, %arg8: memref<32x64xf32, #tpu.memory_space<vmem>>, %arg9: memref<1x64xf32, #tpu.memory_space<vmem>>, %arg10: memref<64x128xf32, #tpu.memory_space<vmem>>, %arg11: memref<1x128xf32, #tpu.memory_space<vmem>>, %arg12: memref<32x128xf32, #tpu.memory_space<vmem>>) attributes {dimension_semantics = [#tpu.dimension_semantics<parallel>], iteration_bounds = array<i64: 2>, scalar_prefetch = 0 : i64, scratch_operands = 0 : i64, tpu.core_type = #tpu.core_type<tc>, window_params = [{transform_indices = @transform_0, window_bounds = array<i64: 32, 128>}, {pipeline_mode = #tpu.pipeline_mode<synchronous>, transform_indices = @transform_1, window_bounds = array<i64: 128, 64>}, {pipeline_mode = #tpu.pipeline_mode<synchronous>, transform_indices = @transform_2, window_bounds = array<i64: 1, 64>}, {pipeline_mode = #tpu.pipeline_mode<synchronous>, transform_indices = @transform_3, window_bounds = array<i64: 64, 32>}, {pipeline_mode = #tpu.pipeline_mode<synchronous>, transform_indices = @transform_4, window_bounds = array<i64: 1, 32>}, {pipeline_mode = #tpu.pipeline_mode<synchronous>, transform_indices = @transform_5, window_bounds = array<i64: 32, 32>}, {pipeline_mode = #tpu.pipeline_mode<synchronous>, transform_indices = @transform_6, window_bounds = array<i64: 1, 32>}, {pipeline_mode = #tpu.pipeline_mode<synchronous>, transform_indices = @transform_7, window_bounds = array<i64: 32, 64>}, {pipeline_mode = #tpu.pipeline_mode<synchronous>, transform_indices = @transform_8, window_bounds = array<i64: 1, 64>}, {pipeline_mode = #tpu.pipeline_mode<synchronous>, transform_indices = @transform_9, window_bounds = array<i64: 64, 128>}, {pipeline_mode = #tpu.pipeline_mode<synchronous>, transform_indices = @transform_10, window_bounds = array<i64: 1, 128>}, {transform_indices = @transform_11, window_bounds = array<i64: 32, 128>}]} {
    %c0 = arith.constant 0 : index
    %c0_0 = arith.constant 0 : index
    %0 = vector.load %arg1[%c0, %c0_0] : memref<32x128xf32, #tpu.memory_space<vmem>>, vector<32x128xf32>
    %c0_1 = arith.constant 0 : index
    %c0_2 = arith.constant 0 : index
    %1 = vector.load %arg2[%c0_1, %c0_2] : memref<128x64xf32, #tpu.memory_space<vmem>>, vector<128x64xf32>
    %cst = arith.constant dense<0.000000e+00> : vector<32x64xf32>
    %2 = tpu.matmul %0, %1, %cst {dimension_numbers = #tpu.dot_dimension_numbers<[1], [0], [0], [1], [0, 0, 1, 1], [], []>} : vector<32x128xf32>, vector<128x64xf32>, vector<32x64xf32> -> vector<32x64xf32>
    %c0_3 = arith.constant 0 : index
    %c0_4 = arith.constant 0 : index
    %3 = vector.load %arg3[%c0_3, %c0_4] : memref<1x64xf32, #tpu.memory_space<vmem>>, vector<1x64xf32>
    %4 = vector.broadcast %3 : vector<1x64xf32> to vector<32x64xf32>
    %5 = arith.addf %2, %4 : vector<32x64xf32>
    %6 = math.tanh %5 : vector<32x64xf32>
    %c0_5 = arith.constant 0 : index
    %c0_6 = arith.constant 0 : index
    %7 = vector.load %arg4[%c0_5, %c0_6] : memref<64x32xf32, #tpu.memory_space<vmem>>, vector<64x32xf32>
    %cst_7 = arith.constant dense<0.000000e+00> : vector<32x32xf32>
    %8 = tpu.matmul %6, %7, %cst_7 {dimension_numbers = #tpu.dot_dimension_numbers<[1], [0], [0], [1], [0, 0, 1, 1], [], []>} : vector<32x64xf32>, vector<64x32xf32>, vector<32x32xf32> -> vector<32x32xf32>
    %c0_8 = arith.constant 0 : index
    %c0_9 = arith.constant 0 : index
    %9 = vector.load %arg5[%c0_8, %c0_9] : memref<1x32xf32, #tpu.memory_space<vmem>>, vector<1x32xf32>
    %10 = vector.broadcast %9 : vector<1x32xf32> to vector<32x32xf32>
    %11 = arith.addf %8, %10 : vector<32x32xf32>
    %12 = math.tanh %11 : vector<32x32xf32>
    %c0_10 = arith.constant 0 : index
    %c0_11 = arith.constant 0 : index
    %13 = vector.load %arg6[%c0_10, %c0_11] : memref<32x32xf32, #tpu.memory_space<vmem>>, vector<32x32xf32>
    %cst_12 = arith.constant dense<0.000000e+00> : vector<32x32xf32>
    %14 = tpu.matmul %12, %13, %cst_12 {dimension_numbers = #tpu.dot_dimension_numbers<[1], [0], [0], [1], [0, 0, 1, 1], [], []>} : vector<32x32xf32>, vector<32x32xf32>, vector<32x32xf32> -> vector<32x32xf32>
    %c0_13 = arith.constant 0 : index
    %c0_14 = arith.constant 0 : index
    %15 = vector.load %arg7[%c0_13, %c0_14] : memref<1x32xf32, #tpu.memory_space<vmem>>, vector<1x32xf32>
    %16 = vector.broadcast %15 : vector<1x32xf32> to vector<32x32xf32>
    %17 = arith.addf %14, %16 : vector<32x32xf32>
    %18 = math.tanh %17 : vector<32x32xf32>
    %c0_15 = arith.constant 0 : index
    %c0_16 = arith.constant 0 : index
    %19 = vector.load %arg8[%c0_15, %c0_16] : memref<32x64xf32, #tpu.memory_space<vmem>>, vector<32x64xf32>
    %cst_17 = arith.constant dense<0.000000e+00> : vector<32x64xf32>
    %20 = tpu.matmul %18, %19, %cst_17 {dimension_numbers = #tpu.dot_dimension_numbers<[1], [0], [0], [1], [0, 0, 1, 1], [], []>} : vector<32x32xf32>, vector<32x64xf32>, vector<32x64xf32> -> vector<32x64xf32>
    %c0_18 = arith.constant 0 : index
    %c0_19 = arith.constant 0 : index
    %21 = vector.load %arg9[%c0_18, %c0_19] : memref<1x64xf32, #tpu.memory_space<vmem>>, vector<1x64xf32>
    %22 = vector.broadcast %21 : vector<1x64xf32> to vector<32x64xf32>
    %23 = arith.addf %20, %22 : vector<32x64xf32>
    %24 = math.tanh %23 : vector<32x64xf32>
    %c0_20 = arith.constant 0 : index
    %c0_21 = arith.constant 0 : index
    %25 = vector.load %arg10[%c0_20, %c0_21] : memref<64x128xf32, #tpu.memory_space<vmem>>, vector<64x128xf32>
    %cst_22 = arith.constant dense<0.000000e+00> : vector<32x128xf32>
    %26 = tpu.matmul %24, %25, %cst_22 {dimension_numbers = #tpu.dot_dimension_numbers<[1], [0], [0], [1], [0, 0, 1, 1], [], []>} : vector<32x64xf32>, vector<64x128xf32>, vector<32x128xf32> -> vector<32x128xf32>
    %c0_23 = arith.constant 0 : index
    %c0_24 = arith.constant 0 : index
    %27 = vector.load %arg11[%c0_23, %c0_24] : memref<1x128xf32, #tpu.memory_space<vmem>>, vector<1x128xf32>
    %28 = vector.broadcast %27 : vector<1x128xf32> to vector<32x128xf32>
    %29 = arith.addf %26, %28 : vector<32x128xf32>
    %c0_25 = arith.constant 0 : index
    %c0_26 = arith.constant 0 : index
    %30 = vector.load %arg12[%c0_25, %c0_26] : memref<32x128xf32, #tpu.memory_space<vmem>>, vector<32x128xf32>
    tpu.vector_store %arg12[%c0_25, %c0_26], %29 {strides = array<i32>} : memref<32x128xf32, #tpu.memory_space<vmem>>, vector<32x128xf32>,
    return
  }
  func.func @transform_0(%arg0: i32) -> (i32, i32) {
    %c0_i32 = arith.constant 0 : i32
    %c0_i32_0 = arith.constant 0 : i32
    return %arg0, %c0_i32 : i32, i32
  }
  func.func @transform_1(%arg0: i32) -> (i32, i32) {
    %c0_i32 = arith.constant 0 : i32
    %c0_i32_0 = arith.constant 0 : i32
    %c0_i32_1 = arith.constant 0 : i32
    return %c0_i32, %c0_i32_0 : i32, i32
  }
  func.func @transform_2(%arg0: i32) -> (i32, i32) {
    %c0_i32 = arith.constant 0 : i32
    %c0_i32_0 = arith.constant 0 : i32
    %c0_i32_1 = arith.constant 0 : i32
    return %c0_i32, %c0_i32_0 : i32, i32
  }
  func.func @transform_3(%arg0: i32) -> (i32, i32) {
    %c0_i32 = arith.constant 0 : i32
    %c0_i32_0 = arith.constant 0 : i32
    %c0_i32_1 = arith.constant 0 : i32
    return %c0_i32, %c0_i32_0 : i32, i32
  }
  func.func @transform_4(%arg0: i32) -> (i32, i32) {
    %c0_i32 = arith.constant 0 : i32
    %c0_i32_0 = arith.constant 0 : i32
    %c0_i32_1 = arith.constant 0 : i32
    return %c0_i32, %c0_i32_0 : i32, i32
  }
  func.func @transform_5(%arg0: i32) -> (i32, i32) {
    %c0_i32 = arith.constant 0 : i32
    %c0_i32_0 = arith.constant 0 : i32
    %c0_i32_1 = arith.constant 0 : i32
    return %c0_i32, %c0_i32_0 : i32, i32
  }
  func.func @transform_6(%arg0: i32) -> (i32, i32) {
    %c0_i32 = arith.constant 0 : i32
    %c0_i32_0 = arith.constant 0 : i32
    %c0_i32_1 = arith.constant 0 : i32
    return %c0_i32, %c0_i32_0 : i32, i32
  }
  func.func @transform_7(%arg0: i32) -> (i32, i32) {
    %c0_i32 = arith.constant 0 : i32
    %c0_i32_0 = arith.constant 0 : i32
    %c0_i32_1 = arith.constant 0 : i32
    return %c0_i32, %c0_i32_0 : i32, i32
  }
  func.func @transform_8(%arg0: i32) -> (i32, i32) {
    %c0_i32 = arith.constant 0 : i32
    %c0_i32_0 = arith.constant 0 : i32
    %c0_i32_1 = arith.constant 0 : i32
    return %c0_i32, %c0_i32_0 : i32, i32
  }
  func.func @transform_9(%arg0: i32) -> (i32, i32) {
    %c0_i32 = arith.constant 0 : i32
    %c0_i32_0 = arith.constant 0 : i32
    %c0_i32_1 = arith.constant 0 : i32
    return %c0_i32, %c0_i32_0 : i32, i32
  }
  func.func @transform_10(%arg0: i32) -> (i32, i32) {
    %c0_i32 = arith.constant 0 : i32
    %c0_i32_0 = arith.constant 0 : i32
    %c0_i32_1 = arith.constant 0 : i32
    return %c0_i32, %c0_i32_0 : i32, i32
  }
  func.func @transform_11(%arg0: i32) -> (i32, i32) {
    %c0_i32 = arith.constant 0 : i32
    %c0_i32_0 = arith.constant 0 : i32
    return %arg0, %c0_i32 : i32, i32
  }
}

</mosaic_0001>

<bundles_post_ra>
// kernel: tpu_custom_call.1
= control target key start
LH: loop header
LB: loop body
LE: loop exit
PB: predicated region body
PF: predicated region fallthrough
CT: control target
= control target key end

     0   :  { %16 = vsyncpa [#allocation3], 0  ;;  %s1789_s0 = inlined_call_operand.vmem [shape: f32[64,128], index: 0, kind: input, shape index: {}]   ;;  %s1790_s1 = inlined_call_operand.vmem [shape: f32[128,64], index: 1, kind: input, shape index: {}]   ;;  %s1791_s2 = inlined_call_operand.vmem [shape: f32[1,64], index: 2, kind: input, shape index: {}]   ;;  %s1792_s3 = inlined_call_operand.vmem [shape: f32[64,32], index: 3, kind: input, shape index: {}]   ;;  %s1793_s4 = inlined_call_operand.vmem [shape: f32[1,32], index: 4, kind: input, shape index: {}]   ;;  %s1794_s5 = inlined_call_operand.vmem [shape: f32[32,32], index: 5, kind: input, shape index: {}]   ;;  %s1795_s6 = inlined_call_operand.vmem [shape: f32[1,32], index: 6, kind: input, shape index: {}]   ;;  %s1796_s7 = inlined_call_operand.vmem [shape: f32[32,64], index: 7, kind: input, shape index: {}]   ;;  %s1797_s8 = inlined_call_operand.vmem [shape: f32[1,64], index: 8, kind: input, shape index: {}]   ;;  %s1798_s9 = inlined_call_operand.vmem [shape: f32[64,128], index: 9, kind: input, shape index: {}]   ;;  %s1799_s10 = inlined_call_operand.vmem [shape: f32[1,128], index: 10, kind: input, shape index: {}]   ;;  %s1800_s11 = inlined_call_operand.hbm [shape: f32[64,128], index: 11, kind: output, shape index: {}]  }
   0x1   :  { %18 = vsyncpa [#allocation3 + $0x1], 0  ;;  %s1530_s17 = smov 0   ;;  %s1532_s18 = smov 0  }
   0x2   :  { %s1534_s19 = smov 0   ;;  %s1536_s20 = smov 0  }
   0x3 LB: > { %s1551_s21 = sadd.s32 4294967295, %s1465_s20   ;;  %s1038_s22 = sadd.s32 4294967294, %s1465_s20   ;;  %s1465_s20 = sphi %s1536_s20, %s1808_s20   ;;  %s1461_s19 = sphi %s1534_s19, %s1807_s19   ;;  %s1457_s18 = sphi %s1532_s18, %s1806_s18   ;;  %s1453_s17 = sphi %s1530_s17, %s1805_s17  }
   0x4   : > { %s1555_s23 = sadd.s32 1, %s1465_s20   ;;  %s267_s24 = sadd.s32 1, %s1461_s19 }
   0x5   : > { %s264_s25 = ssub.s32 %s1465_s20, %s1555_s23  ;;  %p277_p0 = scmp.ne.s32.totalorder %s1461_s19, %s1457_s18 }
   0x6   : > { %p265_p1 = scmp.eq.s32.totalorder %s264_s25, 0  ;;  %p278_p2 = scmp.eq.s32.totalorder %s1551_s21, 1 }
   0x7   : > { %p283_p3 = scmp.ne.s32.totalorder %s1457_s18, %s1453_s17  ;;  %p284_p4 = scmp.eq.s32.totalorder %s1038_s22, 1 }
   0x8   : > { %s1566_s26 = scalar_select %p265_p1, %s1461_s19, %s267_s24  }
   0x9   : > { %p1568_p5 = por %p278_p2, %p277_p0  ;;  %p1572_p6 = por %p284_p4, %p283_p3 }
   0xa   : > { %1801 = sst [smem:[#allocation5_spill]] %s1566_s26  ;;  %p1041_p7 = scmp.ge.s32.totalorder %s1465_s20, 1 }
   0xb   : > { %p341_p8 = scmp.lt.s32.totalorder %s1465_s20, 3 }
   0xd   : > { %p342_p9 = pnand %p1041_p7, %p341_p8 }
   0xe   : > { %v392_v0 = vld [vmem:[%s1790_s1] sm:$0xff] (!%p342_p9)  ;;  %v393_v1 = vld [vmem:[%s1790_s1 + $0x8] sm:$0xff] (!%p342_p9)  ;;  %v394_v2 = vld [vmem:[%s1790_s1 + $0x10] sm:$0xff] (!%p342_p9)  ;;  %s1043_s16 = sshll.u32 (!%p342_p9), %s1551_s21, 2  ;;  %vm519_vm0 = vcmask (!%p342_p9), 523264   ;;  %vm632_vm1 = vcmask (!%p342_p9), 261120  }
   0xf   : > { %345 = sbr.rel (%p342_p9) target bundleno = 1191 (0x4a7), region = 64  ;;  %v1242_v3 = vpack.c.bf16 (!%p342_p9), %v393_v1, %v392_v0  ;;  %v395_v4 = vld [vmem:[%s1790_s1 + $0x18] sm:$0xff] (!%p342_p9)  ;;  %p382_p10 = scmp.lt.s32.totalorder (!%p342_p9), %s1043_s16, 7  ;;  %v396_v6 = vld [vmem:[%s1790_s1 + $0x20] sm:$0xff] (!%p342_p9)  ;;  %v397_v7 = vld [vmem:[%s1790_s1 + $0x28] sm:$0xff] (!%p342_p9) }
  0x10   : > { %v1246_v5 = vpack.c.bf16 (!%p342_p9), %v395_v4, %v394_v2  ;;  %v1250_v8 = vpack.c.bf16 (!%p342_p9), %v397_v7, %v396_v6  ;;  %v398_v9 = vld [vmem:[%s1790_s1 + $0x30] sm:$0xff] (!%p342_p9)  ;;  %v399_v10 = vld [vmem:[%s1790_s1 + $0x38] sm:$0xff] (!%p342_p9)  ;;  %v400_v13 = vld [vmem:[%s1790_s1 + $0x40] sm:$0xff] (!%p342_p9)  ;;  %s378_s22 = sand.u32 (!%p342_p9), 1, %s1457_s18   ;;  %s1071_s13 = sshll.u32 (!%p342_p9), %s1551_s21, 9 }
  0x11   : > { %1243 = vmatprep.subr.bf16.mxu0 (!%p342_p9), %v1242_v3  ;;  %v1254_v12 = vpack.c.bf16 (!%p342_p9), %v399_v10, %v398_v9  ;;  %v401_v14 = vld [vmem:[%s1790_s1 + $0x48] sm:$0xff] (!%p342_p9)  ;;  %v402_v16 = vld [vmem:[%s1790_s1 + $0x50] sm:$0xff] (!%p342_p9)  ;;  %v403_v17 = vld [vmem:[%s1790_s1 + $0x58] sm:$0xff] (!%p342_p9)  ;;  %s1042_s24 = sshll.u32 (!%p342_p9), %s378_s22, 5  ;;  %s1748_s15 = scalar_lea.sflag (!%p342_p9), [#allocation3], %s378_s22 }
  0x12   : > { %1245 = vmatpush3.bf16.msra.mxu0 (!%p342_p9), %v1242_v3  ;;  %v1258_v15 = vpack.c.bf16 (!%p342_p9), %v401_v14, %v400_v13  ;;  %v1262_v18 = vpack.c.bf16 (!%p342_p9), %v403_v17, %v402_v16  ;;  %v404_v19 = vld [vmem:[%s1790_s1 + $0x60] sm:$0xff] (!%p342_p9)  ;;  %v405_v20 = vld [vmem:[%s1790_s1 + $0x68] sm:$0xff] (!%p342_p9)  ;;  %v406_v22 = vld [vmem:[%s1790_s1 + $0x70] sm:$0xff] (!%p342_p9) }
  0x13   : > { %1247 = vmatprep.subr.bf16.mxu0 (!%p342_p9), %v1246_v5  ;;  %v1266_v21 = vpack.c.bf16 (!%p342_p9), %v405_v20, %v404_v19  ;;  %v407_v23 = vld [vmem:[%s1790_s1 + $0x78] sm:$0xff] (!%p342_p9)  ;;  %v504_v28 = vld [vmem:[%s1792_s3] sm:$0xff] (!%p342_p9)  ;;  %v505_v29 = vld [vmem:[%s1792_s3 + $0x8] sm:$0xff] (!%p342_p9) }
  0x14   : > { %v1270_v24 = vpack.c.bf16 (!%p342_p9), %v407_v23, %v406_v22  ;;  %v1274_v30 = vpack.c.bf16 (!%p342_p9), %v505_v29, %v504_v28  ;;  %v506_v31 = vld [vmem:[%s1792_s3 + $0x10] sm:$0xff] (!%p342_p9)  ;;  %v507_v32 = vld [vmem:[%s1792_s3 + $0x18] sm:$0xff] (!%p342_p9)  ;;  %v508_v34 = vld [vmem:[%s1792_s3 + $0x20] sm:$0xff] (!%p342_p9) }
  0x15   : > { %v1278_v33 = vpack.c.bf16 (!%p342_p9), %v507_v32, %v506_v31  ;;  %v509_v35 = vld [vmem:[%s1792_s3 + $0x28] sm:$0xff] (!%p342_p9)  ;;  %v510_v37 = vld [vmem:[%s1792_s3 + $0x30] sm:$0xff] (!%p342_p9)  ;;  %v511_v38 = vld [vmem:[%s1792_s3 + $0x38] sm:$0xff] (!%p342_p9) }
  0x16   : > { %s1810_s16 = smov (!%p382_p10, %s1043_s16), 7  ;;  %1249 = vmatpush3.bf16.msra.mxu0 %v1246_v5  ;;  %1275 = vmatprep.subr.bf16.mxu1 %v1274_v30  ;;  %v1282_v36 = vpack.c.bf16 %v509_v35, %v508_v34  ;;  %v1286_v39 = vpack.c.bf16 %v511_v38, %v510_v37  ;;  %v1045_v40 = vld [vmem:[%s1791_s2] ss:$0 sm:$0xff]  ;;  %v622_v54 = vld [vmem:[%s1794_s5 + $0x8] sm:$0xff]  ;;  %v623_v56 = vld [vmem:[%s1794_s5 + $0x10] sm:$0xff] }
  0x17   : > { %s1044_s12 = sshll.u32 %s1810_s16, 3  ;;  %1251 = vmatprep.subr.bf16.mxu0 %v1250_v8  ;;  %1277 = vmatpush3.bf16.msra.mxu1 %v1274_v30  ;;  %v621_v53 = vld [vmem:[%s1794_s5] sm:$0xff]  ;;  %v624_v57 = vld [vmem:[%s1794_s5 + $0x18] sm:$0xff]  ;;  %v735_v9 = vld [vmem:[%s1796_s7 + $0x8] sm:$0xff]  ;;  %s380_s16 = scalar_lea.vmem [#allocation2], %s1042_s24 }
  0x18   : > { %s1606_s29 = scalar_lea.vmem %s1789_s0, %s1044_s12  ;;  %1279 = vmatprep.subr.bf16.mxu1 %v1278_v33  ;;  %v1290_v55 = vpack.c.bf16 %v622_v54, %v621_v53  ;;  %v1294_v58 = vpack.c.bf16 %v624_v57, %v623_v56  ;;  %v1046_v59 = vld [vmem:[%s1793_s4] ss:$0 sm:$0xff]  ;;  %v847_v28 = vld [vmem:[%s1798_s9 + $0x8] sm:$0xff]  ;;  %v848_v30 = vld [vmem:[%s1798_s9 + $0x10] sm:$0xff]  ;;  %s976_s30 = sshll.u32 %s380_s16, 4  ;;  %s1741_s30 = int_to_ptr.vmem [resolvable:$true] %s976_s30 }
  0x19   : > { %v388_v11 = vld [vmem:[%s1606_s29] sm:$0xff]  ;;  %v389_v25 = vld [vmem:[%s1606_s29 + $0x8] sm:$0xff]  ;;  %v390_v26 = vld [vmem:[%s1606_s29 + $0x10] sm:$0xff]  ;;  %s1746_s12 = scalar_lea.hbm %s1800_s11, %s1071_s13  ;;  %s1403_s21 = scalar_lea.vmem %s1741_s30, 512 }
  0x1a   : > { %1164 = vmatprep.mubr.f32.mxu0 %v388_v11  ;;  %1253 = vmatpush3.bf16.msra.mxu0 %v1250_v8  ;;  %v391_v27 = vld [vmem:[%s1606_s29 + $0x18] sm:$0xff]  ;;  %v734_v8 = vld [vmem:[%s1796_s7] sm:$0xff]  ;;  %v736_v11 = vld [vmem:[%s1796_s7 + $0x10] sm:$0xff]  ;;  %p1404_p11 = scmp.ne.s32.totalorder %s1741_s30, %s1403_s21  ;;  %s1467_s24 = smov [#allocation2]  }
  0x1b   : > { %1255 = vmatprep.subr.bf16.mxu0 %v1254_v12  ;;  %1281 = vmatpush3.bf16.msra.mxu1 %v1278_v33  ;;  %v1298_v10 = vpack.c.bf16 %v735_v9, %v734_v8  ;;  %v1051_v14 = vld [vmem:[%s1795_s6] ss:$0 sm:$0xff]  ;;  %v849_v31 = vld [vmem:[%s1798_s9 + $0x18] sm:$0xff]  ;;  %v851_v34 = vld [vmem:[%s1798_s9 + $0x28] sm:$0xff]  ;;  %s1407_s25 = sshll.u32 %s1467_s24, 4  ;;  %s1408_s25 = int_to_ptr.vmem [resolvable:$false] %s1407_s25 }
  0x1c   : > { %1283 = vmatprep.subr.bf16.mxu1 %v1282_v36  ;;  %v1310_v32 = vpack.c.bf16 %v849_v31, %v848_v30  ;;  %v850_v33 = vld [vmem:[%s1798_s9 + $0x20] sm:$0xff]  ;;  %v853_v37 = vld [vmem:[%s1798_s9 + $0x38] sm:$0xff]  ;;  %p1405_p12 = pnand %p1404_p11, %p1568_p5  ;;  %s1409_s26 = scalar_lea.vmem %s1408_s25, 1024 }
  0x1d   : > { %v1314_v35 = vpack.c.bf16 %v851_v34, %v850_v33  ;;  %p1410_p0 = scmp.lt.s32.totalorder %s1741_s30, %s1408_s25  ;;  %p1411_p1 = scmp.lt.s32.totalorder %s1409_s26, %s1403_s21 }
  0x1e   : > { %1257 = vmatpush3.bf16.msra.mxu0 %v1254_v12  ;;  %v737_v12 = vld [vmem:[%s1796_s7 + $0x18] sm:$0xff]  ;;  %p1406_p13 = pneg %p1405_p12 }
  0x1f   : > { %1259 = vmatprep.subr.bf16.mxu0 %v1258_v15  ;;  %1285 = vmatpush3.bf16.msra.mxu1 %v1282_v36  ;;  %v1302_v13 = vpack.c.bf16 %v737_v12, %v736_v11  ;;  %v852_v36 = vld [vmem:[%s1798_s9 + $0x30] sm:$0xff]  ;;  %p1412_p2 = por %p1411_p1, %p1410_p0 }
  0x20   : > { %1287 = vmatprep.subr.bf16.mxu1 %v1286_v39  ;;  %v1318_v38 = vpack.c.bf16 %v853_v37, %v852_v36 }
  0x21   : > { %p1413_p3 = pnand %p1412_p2, %p1406_p13 }
  0x22   : > { %1261 = vmatpush3.bf16.msra.mxu0 %v1258_v15 }
  0x23   : > { %1263 = vmatprep.subr.bf16.mxu0 %v1262_v18  ;;  %1289 = vmatpush3.bf16.msra.mxu1 %v1286_v39  ;;  %v1056_v39 = vld [vmem:[%s1797_s8] ss:$0 sm:$0xff] }
  0x24   : > { %1291 = vmatprep.subr.bf16.mxu1 %v1290_v55 }
  0x26   : > { %1265 = vmatpush3.bf16.msra.mxu0 %v1262_v18 }
  0x27   : > { %1267 = vmatprep.subr.bf16.mxu0 %v1266_v21 }
  0x2a   : > { %1269 = vmatpush3.bf16.msra.mxu0 %v1266_v21 }
  0x2b   : > { %1271 = vmatprep.subr.bf16.mxu0 %v1270_v24 }
  0x2e   : > { %1273 = vmatpush3.bf16.msra.mxu0 %v1270_v24 }
  0x31   : > { %1165 = vmatmul.mubr.f32.vlgmr.msra.gmra.mrb[0].mxu0 %v389_v25 }
  0x32   : > { %1167 = vmatprep.mubr.f32.mxu0 %v390_v26 }
  0x35   : > { %1168 = vmatmul.mubr.f32.gmra.mrb[2].mxu0 %v391_v27  ;;  %v846_v27 = vld [vmem:[%s1798_s9] sm:$0xff] }
  0x36   : > { %v1306_v29 = vpack.c.bf16 %v847_v28, %v846_v27 }
  0x38   : > { %1307 = vmatprep.subr.bf16.mxu0 %v1306_v29 }
  0x39   : > { %1309 = vmatpush3.bf16.msra.mxu0 %v1306_v29 }
  0x3a   : > { %1311 = vmatprep.subr.bf16.mxu0 %v1310_v32 }
  0x3d   : > { %1313 = vmatpush3.bf16.msra.mxu0 %v1310_v32 }
  0x3e   : > { %1315 = vmatprep.subr.bf16.mxu0 %v1314_v35 }
  0x41   : > { %1317 = vmatpush3.bf16.msra.mxu0 %v1314_v35 }
  0x42   : > { %1319 = vmatprep.subr.bf16.mxu0 %v1318_v38 }
  0x45   : > { %1321 = vmatpush3.bf16.msra.mxu0 %v1318_v38 }
 0x104   : > { %v1166_v41 = vpop.f32.mrb[0].mxu0 }
 0x105   : > { %v487_v42 = vadd.f32 %v1166_v41, %v1045_v40  ;;  %v481_v43 = vpop.f32.mrb[1].mxu0 }
 0x106   : > { %v482_v44 = vadd.f32 %v1045_v40, %v481_v43 }
 0x108   : > { %1371 = vtanh.f32 %v482_v44  ;;  %v1169_v45 = vpop.f32.mrb[2].mxu0 }
 0x109   : > { %1373 = vtanh.f32 %v487_v42  ;;  %v497_v46 = vadd.f32 %v1169_v45, %v1045_v40  ;;  %v491_v47 = vpop.f32.mrb[3].mxu0 }
 0x10a   : > { %v492_v48 = vadd.f32 %v1045_v40, %v491_v47 }
 0x10c   : > { %1375 = vtanh.f32 %v492_v48 }
 0x10d   : > { %1377 = vtanh.f32 %v497_v46 }
 0x112   : > { %v1372_v49 = vpop.eup %1371 }
 0x113   : > { %v1374_v50 = vpop.eup %1373  ;;  %1186 = vmatprep.mubr.msk.f32.mxu1 %vm519_vm0, %v1372_v49 }
 0x114   : > { %1187 = vmatmul.mubr.msk.f32.vlgmr.msra.gmra.mrb[0].mxu1 %vm519_vm0, %v1374_v50 }
 0x115   : > { %1293 = vmatpush3.bf16.msra.mxu1 %v1290_v55 }
 0x116   : > { %v1376_v51 = vpop.eup %1375  ;;  %1295 = vmatprep.subr.bf16.mxu1 %v1294_v58 }
 0x117   : > { %v1378_v52 = vpop.eup %1377  ;;  %1189 = vmatprep.mubr.msk.f32.mxu1 %vm519_vm0, %v1376_v51 }
 0x118   : > { %1190 = vmatmul.mubr.msk.f32.gmra.mrb[2].mxu1 %vm519_vm0, %v1378_v52  ;;  %v1061_v52 = vld [vmem:[%s1799_s10] ss:$0 sm:$0xff] }
 0x119   : > { %1297 = vmatpush3.bf16.msra.mxu1 %v1294_v58 }
 0x11a   : > { %1299 = vmatprep.subr.bf16.mxu1 %v1298_v10 }
 0x1e7   : > { %v1188_v60 = vpop.f32.mrb[0].mxu1 }
 0x1e8   : > { %v604_v61 = vadd.f32 %v1188_v60, %v1046_v59  ;;  %v598_v62 = vpop.f32.mrb[1].mxu1 }
 0x1e9   : > { %v599_v63 = vadd.f32 %v1046_v59, %v598_v62 }
 0x1eb   : > { %1379 = vtanh.f32 %v599_v63  ;;  %v1191_v0 = vpop.f32.mrb[2].mxu1 }
 0x1ec   : > { %1381 = vtanh.f32 %v604_v61  ;;  %v614_v1 = vadd.f32 %v1191_v0, %v1046_v59  ;;  %v608_v2 = vpop.f32.mrb[3].mxu1 }
 0x1ed   : > { %v609_v3 = vadd.f32 %v1046_v59, %v608_v2 }
 0x1ef   : > { %1383 = vtanh.f32 %v609_v3 }
 0x1f0   : > { %1385 = vtanh.f32 %v614_v1 }
 0x1f5   : > { %v1380_v4 = vpop.eup %1379 }
 0x1f6   : > { %v1382_v5 = vpop.eup %1381  ;;  %1200 = vmatprep.mubr.msk.f32.mxu1 %vm632_vm1, %v1380_v4 }
 0x1f7   : > { %1201 = vmatmul.mubr.msk.f32.vlgmr.msra.gmra.mrb[4].mxu1 %vm632_vm1, %v1382_v5 }
 0x1f8   : > { %1301 = vmatpush3.bf16.msra.mxu1 %v1298_v10 }
 0x1f9   : > { %v1384_v6 = vpop.eup %1383  ;;  %1303 = vmatprep.subr.bf16.mxu1 %v1302_v13 }
 0x1fa   : > { %v1386_v7 = vpop.eup %1385  ;;  %1203 = vmatprep.mubr.msk.f32.mxu1 %vm632_vm1, %v1384_v6 }
 0x1fb   : > { %1204 = vmatmul.mubr.msk.f32.gmra.mrb[6].mxu1 %vm632_vm1, %v1386_v7 }
 0x1fc   : > { %1305 = vmatpush3.bf16.msra.mxu1 %v1302_v13 }
 0x1fd   : > { %1322 = vmatprep.subr.bf16.mxu1 %v1306_v29 }
 0x2ca   : > { %v1202_v15 = vpop.f32.mrb[4].mxu1 }
 0x2cb   : > { %v717_v16 = vadd.f32 %v1202_v15, %v1051_v14  ;;  %v711_v17 = vpop.f32.mrb[5].mxu1 }
 0x2cc   : > { %v712_v18 = vadd.f32 %v1051_v14, %v711_v17 }
 0x2ce   : > { %1387 = vtanh.f32 %v712_v18  ;;  %v1205_v19 = vpop.f32.mrb[6].mxu1 }
 0x2cf   : > { %1389 = vtanh.f32 %v717_v16  ;;  %v727_v20 = vadd.f32 %v1205_v19, %v1051_v14  ;;  %v721_v21 = vpop.f32.mrb[7].mxu1 }
 0x2d0   : > { %v722_v22 = vadd.f32 %v1051_v14, %v721_v21 }
 0x2d2   : > { %1391 = vtanh.f32 %v722_v22 }
 0x2d3   : > { %1393 = vtanh.f32 %v727_v20 }
 0x2d8   : > { %v1388_v23 = vpop.eup %1387 }
 0x2d9   : > { %v1390_v24 = vpop.eup %1389  ;;  %1214 = vmatprep.mubr.msk.f32.mxu1 %vm632_vm1, %v1388_v23 }
 0x2da   : > { %1215 = vmatmul.mubr.msk.f32.vlgmr.msra.gmra.mrb[8].mxu1 %vm632_vm1, %v1390_v24 }
 0x2db   : > { %1326 = vmatpush3.bf16.msra.mxu1 %v1306_v29 }
 0x2dc   : > { %v1392_v25 = vpop.eup %1391  ;;  %1323 = vmatprep.subr.bf16.mxu1 %v1310_v32 }
 0x2dd   : > { %v1394_v26 = vpop.eup %1393  ;;  %1217 = vmatprep.mubr.msk.f32.mxu1 %vm632_vm1, %v1392_v25 }
 0x2de   : > { %1218 = vmatmul.mubr.msk.f32.gmra.mrb[10].mxu1 %vm632_vm1, %v1394_v26 }
 0x2df   : > { %1327 = vmatpush3.bf16.msra.mxu1 %v1310_v32 }
 0x2e0   : > { %1324 = vmatprep.subr.bf16.mxu1 %v1314_v35 }
 0x2e3   : > { %1328 = vmatpush3.bf16.msra.mxu1 %v1314_v35 }
 0x2e4   : > { %1325 = vmatprep.subr.bf16.mxu1 %v1318_v38 }
 0x2e7   : > { %1329 = vmatpush3.bf16.msra.mxu1 %v1318_v38 }
 0x3ad   : > { %v1216_v40 = vpop.f32.mrb[8].mxu1 }
 0x3ae   : > { %v829_v41 = vadd.f32 %v1216_v40, %v1056_v39  ;;  %v823_v42 = vpop.f32.mrb[9].mxu1 }
 0x3af   : > { %v824_v43 = vadd.f32 %v1056_v39, %v823_v42 }
 0x3b1   : > { %1395 = vtanh.f32 %v824_v43  ;;  %v1219_v44 = vpop.f32.mrb[10].mxu1 }
 0x3b2   : > { %1397 = vtanh.f32 %v829_v41  ;;  %v839_v45 = vadd.f32 %v1219_v44, %v1056_v39  ;;  %v833_v46 = vpop.f32.mrb[11].mxu1 }
 0x3b3   : > { %v834_v47 = vadd.f32 %v1056_v39, %v833_v46 }
 0x3b5   : > { %1399 = vtanh.f32 %v834_v47 }
 0x3b6   : > { %1401 = vtanh.f32 %v839_v45 }
 0x3bb   : > { %v1396_v48 = vpop.eup %1395 }
 0x3bc   : > { %v1398_v49 = vpop.eup %1397  ;;  %1236 = vmatprep.mubr.msk.f32.mxu0 %vm519_vm0, %v1396_v48 }
 0x3bd   : > { %1237 = vmatmul.mubr.msk.f32.vlgmr.msra.gmra.mrb[4].mxu0 %vm519_vm0, %v1398_v49 }
 0x3bf   : > { %v1400_v50 = vpop.eup %1399 }
 0x3c0   : > { %v1402_v51 = vpop.eup %1401  ;;  %1239 = vmatprep.mubr.msk.f32.mxu1 %vm519_vm0, %v1400_v50 }
 0x3c1   : > { %1240 = vmatmul.mubr.msk.f32.vlgmr.msra.gmra.mrb[12].mxu1 %vm519_vm0, %v1402_v51 }
 0x490   : > { %v1238_v53 = vpop.f32.mrb[4].mxu0 }
 0x491   : > { %v945_v54 = vadd.f32 %v1238_v53, %v1061_v52  ;;  %v939_v55 = vpop.f32.mrb[5].mxu0 }
 0x492   : > { %v940_v56 = vadd.f32 %v1061_v52, %v939_v55 }
 0x493   : > { %959 = vst [vmem:[%s380_s16 + $0x8] sm:$0xff] %v945_v54 }
 0x494   : > { %958 = vst [vmem:[%s380_s16] sm:$0xff] %v940_v56  ;;  %v1241_v57 = vpop.f32.mrb[12].mxu1 }
 0x495   : > { %v955_v58 = vadd.f32 %v1241_v57, %v1061_v52  ;;  %v949_v59 = vpop.f32.mrb[13].mxu1 }
 0x496   : > { %v950_v60 = vadd.f32 %v1061_v52, %v949_v59 }
 0x497   : > { %961 = vst [vmem:[%s380_s16 + $0x18] sm:$0xff] %v955_v58 }
 0x498   : > { %960 = vst [vmem:[%s380_s16 + $0x10] sm:$0xff] %v950_v60 }
 0x499   : > { %1416 = shalt.err (!%p1413_p3)
}
 0x49a   : > { %s1417_s22 = scalar_lea.hbm %s1746_s12, 512  ;;  %s1421_s29 = scalar_lea.hbm %s1800_s11, 1024 }
 0x49b   : > { %p1418_p4 = scmp.ne.s32.totalorder %s1746_s12, %s1417_s22  ;;  %p1422_p9 = scmp.lt.u32.totalorder %s1746_s12, %s1800_s11 }
 0x49c   : > { %p1423_p10 = scmp.lt.u32.totalorder %s1421_s29, %s1417_s22  ;;  %p1425_p12 = scmp.lt.u32.totalorder %s1417_s22, %s1746_s12 }
 0x49d   : > { %p1419_p7 = pnand %p1418_p4, %p1568_p5 }
 0x49e   : > { %p1424_p11 = por %p1423_p10, %p1422_p9 }
 0x49f   : > { %p1420_p8 = pneg %p1419_p7 }
 0x4a0   : > { %p1426_p13 = por %p1425_p12, %p1424_p11 }
 0x4a2   : > { %p1427_p0 = pnand %p1426_p13, %p1420_p8 }
 0x4a4   : > { %1430 = shalt.err (!%p1427_p0)
}
 0x4a5   : > { %s1468_s21 = smov 128   ;;  %s1469_s25 = smov 8  }
 0x4a6   : > { %1330 = dma.vmem_to_hbm [thread:$0]  (%p1568_p5), %s1741_s30, 512, %s1746_s12, %s1748_s15, %s1468_s21, %s1468_s21, %s1469_s25  }
 0x4a7 PF: > { %p1336_p1 = scmp.ge.s32.totalorder %s1465_s20, 2  ;;  %s991_s26 = sand.u32 1, %s1453_s17  }
 0x4a8   : > { %s992_s22 = scalar_lea.sflag [#allocation3], %s991_s26 }
 0x4a9   : > { %p1333_p2 = pnand %p1336_p1, %p1572_p6 }
 0x4ab   : > { %1448 = dma.done.wait (!%p1333_p2), %s992_s22, 512  }
 0x4ac   : > { %1450 = vsyncadd (!%p1333_p2), %s992_s22, 4294966784  ;;  %s1804_s16 = sld [smem:[#allocation5_spill]]  ;;  %p21_p3 = scmp.ge.s32.totalorder %s1555_s23, 4  }
 0x4ad   : > { %s1805_s17 = smov %s1457_s18  ;;  %s1806_s18 = smov %s1461_s19 }
 0x4ae   : > { %s1808_s20 = smov %s1555_s23  ;;  %23 = sbr.rel (!%p21_p3) target bundleno = 3 (0x3), region = 99 }
 0x4b2   : > { %s1807_s19 = smov %s1804_s16 }
 0x4b5   :  { %997 = vsyncpa [#allocation3], 1 }
 0x4b6   :  { %999 = vsyncpa [#allocation3 + $0x1], 1 }

</bundles_post_ra>
